<compile_context>
chip_gen: v5e
topology: v5e:2x2
jax: 0.10.0
libtpu: 0.0.40
codegen_flags: <defaults>
</compile_context>

<pallas_src>
import numpy as np
import jax
import jax.numpy as jnp
from jax.experimental import pallas as pl
from jax.experimental.pallas import tpu as pltpu


# ---------------------------------------------------------------------------
# pe buffer (vectorized replica of the PyTorch __init__ loop)
# ---------------------------------------------------------------------------
def build_pe(h, w, dim):
    assert dim % 4 == 0
    quater = dim // 4
    min_period, max_period = 1.0, 30.0
    i = np.arange(quater, dtype=np.float64)
    p = (i - 1.0) / quater
    period = np.exp((1.0 - p) * np.log(min_period) + p * np.log(max_period))  # (quater,)
    xs = np.arange(h, dtype=np.float64)[:, None, None]
    ys = np.arange(w, dtype=np.float64)[None, :, None]
    ang_x = xs / period[None, None, :] * 2.0 * np.pi
    ang_y = ys / period[None, None, :] * 2.0 * np.pi
    pe = np.zeros((h, w, dim), dtype=np.float32)
    pe[:, :, 0 * quater:1 * quater] = np.broadcast_to(np.sin(ang_x), (h, w, quater))
    pe[:, :, 1 * quater:2 * quater] = np.broadcast_to(np.cos(ang_x), (h, w, quater))
    pe[:, :, 2 * quater:3 * quater] = np.broadcast_to(np.sin(ang_y), (h, w, quater))
    pe[:, :, 3 * quater:4 * quater] = np.broadcast_to(np.cos(ang_y), (h, w, quater))
    return jnp.asarray(pe)


# ---------------------------------------------------------------------------
# Stage 1: y = relu(pe @ w1 + b1) @ w2 + b2   (batch-invariant, computed once)
# ---------------------------------------------------------------------------
def mlp_kernel(pe_ref, w1_ref, b1_ref, w2_ref, b2_ref, y_ref):
    h1 = jnp.dot(pe_ref[...], w1_ref[...], preferred_element_type=jnp.float32) + b1_ref[...]
    h1 = jnp.maximum(h1, 0.0)                                   # ReLU on VPU
    y = jnp.dot(h1, w2_ref[...], preferred_element_type=jnp.float32) + b2_ref[...]
    y_ref[...] = y.astype(y_ref.dtype)


def compute_mlp_pe(pe_flat, w1, b1_2d, w2, b2_2d, out_dtype):
    hw, d = pe_flat.shape
    return pl.pallas_call(
        mlp_kernel,
        out_shape=jax.ShapeDtypeStruct((hw, d), out_dtype),
        grid_spec=pltpu.PrefetchScalarGridSpec(
            num_scalar_prefetch=0,
            grid=(1,),
            in_specs=[
                pl.BlockSpec((hw, d), lambda i: (0, 0)),   # pe
                pl.BlockSpec((d, d), lambda i: (0, 0)),    # w1
                pl.BlockSpec((1, d), lambda i: (0, 0)),    # b1
                pl.BlockSpec((d, d), lambda i: (0, 0)),    # w2
                pl.BlockSpec((1, d), lambda i: (0, 0)),    # b2
            ],
            out_specs=pl.BlockSpec((hw, d), lambda i: (0, 0)),
        ),
        compiler_params=pltpu.CompilerParams(
            vmem_limit_bytes=32 * 1024 * 1024,
        ),
        cost_estimate=pl.CostEstimate(
            flops=4 * hw * d * d,
            transcendentals=0,
            bytes_accessed=(2 * hw * d + 2 * d * d + 2 * d) * 4,
        ),
    )(pe_flat, w1, b1_2d, w2, b2_2d)


# ---------------------------------------------------------------------------
# Stage 2: out[b, r, c] = x[b, r, c] + y[r, c]   (lane/sublane-dense add)
# ---------------------------------------------------------------------------
def add_rows_kernel(y_ref, x_ref, o_ref):
    # y_ref, x_ref, o_ref: (Rt, C).  Batch dim of x/out is squeezed out of the
    # block, so this is a plain same-shape add (no in-kernel broadcast).
    o_ref[...] = x_ref[...] + y_ref[...]


def _divisors(n):
    ds = []
    i = 1
    while i * i <= n:
        if n % i == 0:
            ds.append(i)
            if i != n // i:
                ds.append(n // i)
        i += 1
    return sorted(ds)


def _choose_layout(hwd, dtype_bytes, target_bytes=2 * 1024 * 1024, min_row_blocks=2):
    """Factor the (1024-aligned) per-batch slab hwd into rows * C.

    Returns (C, Rt): lane width C (multiple of 128, divides hwd) and row block
    Rt (multiple of 8, divides hwd // C).  Preference order:
      1) >= 2 row blocks, so the "parallel" grid axis can split across TCs,
      2) x-block <= ~2 MiB (in/out/y double-buffered stays well under 32 MiB),
      3) the largest block satisfying (2), tie-broken by wider lanes.
    """
    assert hwd % 1024 == 0
    best = None
    for db in _divisors(hwd // 128):
        c = 128 * db
        rows = hwd // c
        if rows % 8:
            continue
        for da in _divisors(rows // 8):
            rt = 8 * da
            row_blocks = rows // rt
            blk = rt * c * dtype_bytes
            fits = blk <= target_bytes
            key = (
                1 if row_blocks >= min_row_blocks else 0,
                1 if fits else 0,
                blk if fits else -blk,
                c,
            )
            if best is None or key > best[0]:
                best = (key, c, rt)
    return best[1], best[2]


def pos_embed_2d(x, pe, w1, b1, w2, b2):
    """x: (B, H, W, D).  Returns x + mlp(pe), broadcast over batch."""
    B, H, W, D = x.shape
    assert pe.shape == (H, W, D)
    HW = H * W
    HWD = HW * D
    dtype_bytes = jnp.dtype(x.dtype).itemsize

    # Stage 1: batch-invariant y = mlp(pe), computed exactly once, in x.dtype.
    y = compute_mlp_pe(
        pe.reshape(HW, D).astype(jnp.float32),
        w1, b1.reshape(1, D), w2, b2.reshape(1, D),
        out_dtype=x.dtype,
    )                                                           # (HW, D)

    # Stage 2: lane/sublane-dense streaming add of y onto every batch slab.
    x_flat = x.reshape(B, HWD)
    y_flat = y.reshape(HWD)
    hwd_pad = -(-HWD // 1024) * 1024
    if hwd_pad != HWD:
        # Rare shapes only: pad the flattened per-batch slab so blocks stay
        # (8,128)-dense instead of taking a masked-store fallback path.
        x_flat = jnp.pad(x_flat, ((0, 0), (0, hwd_pad - HWD)))
        y_flat = jnp.pad(y_flat, (0, hwd_pad - HWD))

    C, Rt = _choose_layout(hwd_pad, dtype_bytes)
    rows = hwd_pad // C
    row_blocks = rows // Rt

    x3 = x_flat.reshape(B, rows, C)
    y2 = y_flat.reshape(rows, C)

    out = pl.pallas_call(
        add_rows_kernel,
        out_shape=jax.ShapeDtypeStruct((B, rows, C), x.dtype),
        grid_spec=pltpu.PrefetchScalarGridSpec(
            num_scalar_prefetch=0,
            # Batch innermost: the y block index is unchanged across it, so y
            # is DMA'd from HBM only once per row block (read-once overall).
            grid=(row_blocks, B),
            in_specs=[
                pl.BlockSpec((Rt, C), lambda r, b: (r, 0)),           # y rows
                pl.BlockSpec((None, Rt, C), lambda r, b: (b, r, 0)),  # x rows (1 batch)
            ],
            out_specs=pl.BlockSpec((None, Rt, C), lambda r, b: (b, r, 0)),
        ),
        compiler_params=pltpu.CompilerParams(
            dimension_semantics=("parallel", "arbitrary"),
            vmem_limit_bytes=32 * 1024 * 1024,   # safe ceiling on v5e/v6e/v7x
        ),
        input_output_aliases={1: 0},             # donate x's HBM buffer to the output
        cost_estimate=pl.CostEstimate(
            flops=B * hwd_pad,
            transcendentals=0,
            bytes_accessed=(2 * B * hwd_pad + hwd_pad) * dtype_bytes,
        ),
    )(y2, x3)

    out = out.reshape(B, hwd_pad)
    if hwd_pad != HWD:
        out = out[:, :HWD]
    return out.reshape(B, H, W, D)


# ---------------------------------------------------------------------------
# Pure-JAX reference and self-test
# ---------------------------------------------------------------------------
def reference(x, pe, w1, b1, w2, b2):
    pe_flat = pe.reshape(-1, pe.shape[-1])
    h1 = jnp.maximum(pe_flat @ w1 + b1, 0.0)
    y = (h1 @ w2 + b2).reshape(pe.shape)
    return x + y[None]


if __name__ == "__main__":
    B, H, W, D = 2, 8, 8, 32
    key = jax.random.PRNGKey(0)
    kx, k1, k2, k3, k4 = jax.random.split(key, 5)

    x = jax.random.normal(kx, (B, H, W, D), dtype=jnp.float32)
    # Synthetic parameters for mlp = Linear(D,D) -> ReLU -> Linear(D,D)
    bound = 1.0 / np.sqrt(D)
    w1 = jax.random.uniform(k1, (D, D), jnp.float32, -bound, bound)
    b1 = jax.random.uniform(k2, (D,), jnp.float32, -bound, bound)
    w2 = jax.random.uniform(k3, (D, D), jnp.float32, -bound, bound)
    b2 = jax.random.uniform(k4, (D,), jnp.float32, -bound, bound)
    pe = build_pe(H, W, D)

    # Round matmul operands to bf16-representable f32 values so the MXU matmul
    # and the XLA reference agree to f32-accumulation error regardless of the
    # default f32 matmul pass count on either side.
    def bf16_exact(a):
        return a.astype(jnp.bfloat16).astype(jnp.float32)

    pe, w1, b1, w2, b2 = map(bf16_exact, (pe, w1, b1, w2, b2))

    out = pos_embed_2d(x, pe, w1, b1, w2, b2)
    out = jax.block_until_ready(out)

    ref = reference(x, pe, w1, b1, w2, b2)
    np.testing.assert_allclose(np.asarray(out), np.asarray(ref), rtol=1e-4, atol=1e-4)
    print("KERNEL_OK")
</pallas_src>

<mosaic_0001>
module attributes {stable_mosaic.version = 11 : i64} {
  func.func @mlp_kernel(%arg0: i32, %arg1: memref<64x32xf32, #tpu.memory_space<vmem>>, %arg2: memref<32x32xf32, #tpu.memory_space<vmem>>, %arg3: memref<1x32xf32, #tpu.memory_space<vmem>>, %arg4: memref<32x32xf32, #tpu.memory_space<vmem>>, %arg5: memref<1x32xf32, #tpu.memory_space<vmem>>, %arg6: memref<64x32xf32, #tpu.memory_space<vmem>>) attributes {dimension_semantics = [#tpu.dimension_semantics<arbitrary>], iteration_bounds = array<i64: 1>, scalar_prefetch = 0 : i64, scratch_operands = 0 : i64, tpu.core_type = #tpu.core_type<tc>, window_params = [{pipeline_mode = #tpu.pipeline_mode<synchronous>, transform_indices = @transform_0, window_bounds = array<i64: 64, 32>}, {pipeline_mode = #tpu.pipeline_mode<synchronous>, transform_indices = @transform_1, window_bounds = array<i64: 32, 32>}, {pipeline_mode = #tpu.pipeline_mode<synchronous>, transform_indices = @transform_2, window_bounds = array<i64: 1, 32>}, {pipeline_mode = #tpu.pipeline_mode<synchronous>, transform_indices = @transform_3, window_bounds = array<i64: 32, 32>}, {pipeline_mode = #tpu.pipeline_mode<synchronous>, transform_indices = @transform_4, window_bounds = array<i64: 1, 32>}, {pipeline_mode = #tpu.pipeline_mode<synchronous>, transform_indices = @transform_5, window_bounds = array<i64: 64, 32>}]} {
    %c0 = arith.constant 0 : index
    %c0_0 = arith.constant 0 : index
    %0 = vector.load %arg1[%c0, %c0_0] : memref<64x32xf32, #tpu.memory_space<vmem>>, vector<64x32xf32>
    %c0_1 = arith.constant 0 : index
    %c0_2 = arith.constant 0 : index
    %1 = vector.load %arg2[%c0_1, %c0_2] : memref<32x32xf32, #tpu.memory_space<vmem>>, vector<32x32xf32>
    %cst = arith.constant dense<0.000000e+00> : vector<64x32xf32>
    %2 = tpu.matmul %0, %1, %cst {dimension_numbers = #tpu.dot_dimension_numbers<[1], [0], [0], [1], [0, 0, 1, 1], [], []>} : vector<64x32xf32>, vector<32x32xf32>, vector<64x32xf32> -> vector<64x32xf32>
    %c0_3 = arith.constant 0 : index
    %c0_4 = arith.constant 0 : index
    %3 = vector.load %arg3[%c0_3, %c0_4] : memref<1x32xf32, #tpu.memory_space<vmem>>, vector<1x32xf32>
    %4 = vector.broadcast %3 : vector<1x32xf32> to vector<64x32xf32>
    %5 = arith.addf %2, %4 : vector<64x32xf32>
    %cst_5 = arith.constant 0.000000e+00 : f32
    %6 = vector.broadcast %cst_5 : f32 to vector<64x32xf32>
    %7 = arith.maximumf %5, %6 : vector<64x32xf32>
    %c0_6 = arith.constant 0 : index
    %c0_7 = arith.constant 0 : index
    %8 = vector.load %arg4[%c0_6, %c0_7] : memref<32x32xf32, #tpu.memory_space<vmem>>, vector<32x32xf32>
    %cst_8 = arith.constant dense<0.000000e+00> : vector<64x32xf32>
    %9 = tpu.matmul %7, %8, %cst_8 {dimension_numbers = #tpu.dot_dimension_numbers<[1], [0], [0], [1], [0, 0, 1, 1], [], []>} : vector<64x32xf32>, vector<32x32xf32>, vector<64x32xf32> -> vector<64x32xf32>
    %c0_9 = arith.constant 0 : index
    %c0_10 = arith.constant 0 : index
    %10 = vector.load %arg5[%c0_9, %c0_10] : memref<1x32xf32, #tpu.memory_space<vmem>>, vector<1x32xf32>
    %11 = vector.broadcast %10 : vector<1x32xf32> to vector<64x32xf32>
    %12 = arith.addf %9, %11 : vector<64x32xf32>
    %c0_11 = arith.constant 0 : index
    %c0_12 = arith.constant 0 : index
    %13 = vector.load %arg6[%c0_11, %c0_12] : memref<64x32xf32, #tpu.memory_space<vmem>>, vector<64x32xf32>
    tpu.vector_store %arg6[%c0_11, %c0_12], %12 {strides = array<i32>} : memref<64x32xf32, #tpu.memory_space<vmem>>, vector<64x32xf32>,
    return
  }
  func.func @transform_0(%arg0: i32) -> (i32, i32) {
    %c0_i32 = arith.constant 0 : i32
    %c0_i32_0 = arith.constant 0 : i32
    %c0_i32_1 = arith.constant 0 : i32
    return %c0_i32, %c0_i32_0 : i32, i32
  }
  func.func @transform_1(%arg0: i32) -> (i32, i32) {
    %c0_i32 = arith.constant 0 : i32
    %c0_i32_0 = arith.constant 0 : i32
    %c0_i32_1 = arith.constant 0 : i32
    return %c0_i32, %c0_i32_0 : i32, i32
  }
  func.func @transform_2(%arg0: i32) -> (i32, i32) {
    %c0_i32 = arith.constant 0 : i32
    %c0_i32_0 = arith.constant 0 : i32
    %c0_i32_1 = arith.constant 0 : i32
    return %c0_i32, %c0_i32_0 : i32, i32
  }
  func.func @transform_3(%arg0: i32) -> (i32, i32) {
    %c0_i32 = arith.constant 0 : i32
    %c0_i32_0 = arith.constant 0 : i32
    %c0_i32_1 = arith.constant 0 : i32
    return %c0_i32, %c0_i32_0 : i32, i32
  }
  func.func @transform_4(%arg0: i32) -> (i32, i32) {
    %c0_i32 = arith.constant 0 : i32
    %c0_i32_0 = arith.constant 0 : i32
    %c0_i32_1 = arith.constant 0 : i32
    return %c0_i32, %c0_i32_0 : i32, i32
  }
  func.func @transform_5(%arg0: i32) -> (i32, i32) {
    %c0_i32 = arith.constant 0 : i32
    %c0_i32_0 = arith.constant 0 : i32
    %c0_i32_1 = arith.constant 0 : i32
    return %c0_i32, %c0_i32_0 : i32, i32
  }
}

</mosaic_0001>

<bundles_post_ra>
// kernel: tpu_custom_call.1
= control target key start
LH: loop header
LB: loop body
LE: loop exit
PB: predicated region body
PF: predicated region fallthrough
CT: control target
= control target key end

     0   :  { %vm36_vm0 = vcmask 261120   ;;  %s353_s1 = inlined_call_operand.vmem [shape: f32[32,32], index: 1, kind: input, shape index: {}]   ;;  %s354_s3 = inlined_call_operand.vmem [shape: f32[32,32], index: 3, kind: input, shape index: {}]   ;;  %s355_s0 = inlined_call_operand.vmem [shape: f32[64,32], index: 0, kind: input, shape index: {}]   ;;  %s356_s2 = inlined_call_operand.vmem [shape: f32[1,32], index: 2, kind: input, shape index: {}]   ;;  %s357_s4 = inlined_call_operand.vmem [shape: f32[1,32], index: 4, kind: input, shape index: {}]   ;;  %s358_s5 = inlined_call_operand.vmem [shape: f32[64,32], index: 5, kind: output, shape index: {}]  }
   0x1   :  { %v31_v0 = vld [vmem:[%s353_s1 + $0x18] sm:$0xff]  ;;  %v30_v1 = vld [vmem:[%s353_s1 + $0x10] sm:$0xff]  ;;  %v29_v2 = vld [vmem:[%s353_s1 + $0x8] sm:$0xff] }
   0x2   :  { %211 = vmatpush.msra.mxu2 %v31_v0  ;;  %73 = vmatpush.msra.mxu0 %v31_v0  ;;  %v28_v3 = vld [vmem:[%s353_s1] sm:$0xff]  ;;  %v113_v4 = vld [vmem:[%s354_s3 + $0x18] sm:$0xff]  ;;  %v25_v7 = vld [vmem:[%s355_s0 + $0x28] sm:$0xff] }
   0x3   :  { %v24_v5 = vld [vmem:[%s355_s0 + $0x20] sm:$0xff]  ;;  %215 = vmatpush.msra.mxu3 %v113_v4  ;;  %154 = vmatpush.msra.mxu1 %v113_v4  ;;  %v21_v8 = vld [vmem:[%s355_s0 + $0x8] sm:$0xff]  ;;  %v26_v9 = vld [vmem:[%s355_s0 + $0x30] sm:$0xff] }
   0x4   :  { %212 = vmatpush.msra.mxu2 %v30_v1  ;;  %74 = vmatpush.msra.mxu0 %v30_v1  ;;  %v20_v6 = vld [vmem:[%s355_s0] sm:$0xff]  ;;  %v22_v10 = vld [vmem:[%s355_s0 + $0x10] sm:$0xff]  ;;  %v27_v11 = vld [vmem:[%s355_s0 + $0x38] sm:$0xff] }
   0x5   :  { %v23_v12 = vld [vmem:[%s355_s0 + $0x18] sm:$0xff]  ;;  %v112_v13 = vld [vmem:[%s354_s3 + $0x10] sm:$0xff]  ;;  %v111_v14 = vld [vmem:[%s354_s3 + $0x8] sm:$0xff] }
   0x6   :  { %213 = vmatpush.msra.mxu2 %v29_v2  ;;  %75 = vmatpush.msra.mxu0 %v29_v2  ;;  %v110_v15 = vld [vmem:[%s354_s3] sm:$0xff] }
   0x7   :  { %216 = vmatpush.msra.mxu3 %v112_v13  ;;  %155 = vmatpush.msra.mxu1 %v112_v13  ;;  %v219_v16 = vld [vmem:[%s356_s2] ss:$0 sm:$0xff] }
   0x8   :  { %214 = vmatpush.msra.mxu2 %v28_v3  ;;  %76 = vmatpush.msra.mxu0 %v28_v3  ;;  %v220_v41 = vld [vmem:[%s357_s4] ss:$0 sm:$0xff] }
   0x9   :  { %199 = vmatmul.msk.f32.vlgmr.msra.gmra.mxu2 %vm36_vm0, %v24_v5  ;;  %195 = vmatmul.msk.f32.vlgmr.msra.gmra.mxu0 %vm36_vm0, %v20_v6 }
   0xa   :  { %217 = vmatpush.msra.mxu3 %v111_v14  ;;  %156 = vmatpush.msra.mxu1 %v111_v14 }
   0xc   :  { %218 = vmatpush.msra.mxu3 %v110_v15  ;;  %157 = vmatpush.msra.mxu1 %v110_v15 }
  0x11   :  { %200 = vmatmul.msk.f32.gmra.mxu2 %vm36_vm0, %v25_v7  ;;  %196 = vmatmul.msk.f32.gmra.mxu0 %vm36_vm0, %v21_v8 }
  0x19   :  { %201 = vmatmul.msk.f32.gmra.mxu2 %vm36_vm0, %v26_v9  ;;  %197 = vmatmul.msk.f32.gmra.mxu0 %vm36_vm0, %v22_v10 }
  0x21   :  { %202 = vmatmul.msk.f32.gmra.mxu2 %vm36_vm0, %v27_v11  ;;  %198 = vmatmul.msk.f32.gmra.mxu0 %vm36_vm0, %v23_v12 }
  0x86   :  { %v78_v17 = vpop.f32.mrf.mxu0 }
  0x87   :  { %v79_v18 = vadd.f32 %v219_v16, %v78_v17 }
  0x89   :  { %v102_v19 = vmax.f32 %v79_v18, 0.0 }
  0x8b   :  { %203 = vmatmul.msk.f32.vlgmr.msra.gmra.mxu1 %vm36_vm0, %v102_v19 }
  0x8c   :  { %v90_v20 = vpop.f32.mrf.mxu2 }
  0x8d   :  { %v91_v21 = vadd.f32 %v219_v16, %v90_v20 }
  0x8e   :  { %v81_v22 = vpop.f32.mrf.mxu0 }
  0x8f   :  { %v106_v23 = vmax.f32 %v91_v21, 0.0  ;;  %v82_v24 = vadd.f32 %v219_v16, %v81_v22 }
  0x91   :  { %207 = vmatmul.msk.f32.vlgmr.msra.gmra.mxu3 %vm36_vm0, %v106_v23  ;;  %v103_v25 = vmax.f32 %v82_v24, 0.0 }
  0x93   :  { %204 = vmatmul.msk.f32.gmra.mxu1 %vm36_vm0, %v103_v25 }
  0x94   :  { %v93_v26 = vpop.f32.mrf.mxu2 }
  0x95   :  { %v94_v27 = vadd.f32 %v219_v16, %v93_v26 }
  0x96   :  { %v84_v28 = vpop.f32.mrf.mxu0 }
  0x97   :  { %v107_v29 = vmax.f32 %v94_v27, 0.0  ;;  %v85_v30 = vadd.f32 %v219_v16, %v84_v28 }
  0x99   :  { %208 = vmatmul.msk.f32.gmra.mxu3 %vm36_vm0, %v107_v29  ;;  %v104_v31 = vmax.f32 %v85_v30, 0.0 }
  0x9b   :  { %205 = vmatmul.msk.f32.gmra.mxu1 %vm36_vm0, %v104_v31 }
  0x9c   :  { %v96_v32 = vpop.f32.mrf.mxu2 }
  0x9d   :  { %v97_v33 = vadd.f32 %v219_v16, %v96_v32 }
  0x9e   :  { %v87_v34 = vpop.f32.mrf.mxu0 }
  0x9f   :  { %v108_v35 = vmax.f32 %v97_v33, 0.0  ;;  %v88_v36 = vadd.f32 %v219_v16, %v87_v34 }
  0xa1   :  { %209 = vmatmul.msk.f32.gmra.mxu3 %vm36_vm0, %v108_v35  ;;  %v105_v37 = vmax.f32 %v88_v36, 0.0 }
  0xa3   :  { %206 = vmatmul.msk.f32.gmra.mxu1 %vm36_vm0, %v105_v37 }
  0xa4   :  { %v99_v38 = vpop.f32.mrf.mxu2 }
  0xa5   :  { %v100_v39 = vadd.f32 %v219_v16, %v99_v38 }
  0xa7   :  { %v109_v40 = vmax.f32 %v100_v39, 0.0 }
  0xa9   :  { %210 = vmatmul.msk.f32.gmra.mxu3 %vm36_vm0, %v109_v40 }
 0x108   :  { %v159_v42 = vpop.f32.mrf.mxu1 }
 0x109   :  { %v160_v43 = vadd.f32 %v220_v41, %v159_v42 }
 0x10b   :  { %183 = vst.msk [vmem:[%s358_s5] sm:$0xff] %vm36_vm0, %v160_v43 }
 0x110   :  { %v162_v44 = vpop.f32.mrf.mxu1 }
 0x111   :  { %v163_v45 = vadd.f32 %v220_v41, %v162_v44 }
 0x113   :  { %184 = vst.msk [vmem:[%s358_s5 + $0x8] sm:$0xff] %vm36_vm0, %v163_v45 }
 0x114   :  { %v171_v46 = vpop.f32.mrf.mxu3 }
 0x115   :  { %v172_v47 = vadd.f32 %v220_v41, %v171_v46 }
 0x117   :  { %187 = vst.msk [vmem:[%s358_s5 + $0x20] sm:$0xff] %vm36_vm0, %v172_v47 }
 0x118   :  { %v165_v48 = vpop.f32.mrf.mxu1 }
 0x119   :  { %v166_v49 = vadd.f32 %v220_v41, %v165_v48 }
 0x11b   :  { %185 = vst.msk [vmem:[%s358_s5 + $0x10] sm:$0xff] %vm36_vm0, %v166_v49 }
 0x11c   :  { %v174_v50 = vpop.f32.mrf.mxu3 }
 0x11d   :  { %v175_v51 = vadd.f32 %v220_v41, %v174_v50 }
 0x11f   :  { %188 = vst.msk [vmem:[%s358_s5 + $0x28] sm:$0xff] %vm36_vm0, %v175_v51 }
 0x120   :  { %v168_v52 = vpop.f32.mrf.mxu1 }
 0x121   :  { %v169_v53 = vadd.f32 %v220_v41, %v168_v52 }
 0x123   :  { %186 = vst.msk [vmem:[%s358_s5 + $0x18] sm:$0xff] %vm36_vm0, %v169_v53 }
 0x124   :  { %v177_v54 = vpop.f32.mrf.mxu3 }
 0x125   :  { %v178_v55 = vadd.f32 %v220_v41, %v177_v54 }
 0x127   :  { %189 = vst.msk [vmem:[%s358_s5 + $0x30] sm:$0xff] %vm36_vm0, %v178_v55 }
 0x12c   :  { %v180_v56 = vpop.f32.mrf.mxu3 }
 0x12d   :  { %v181_v57 = vadd.f32 %v220_v41, %v180_v56 }
 0x12f   :  { %190 = vst.msk [vmem:[%s358_s5 + $0x38] sm:$0xff] %vm36_vm0, %v181_v57 }

</bundles_post_ra>
